<compile_context>
chip_gen: v7x
topology: tpu7x:2x2x1
jax: 0.10.0
libtpu: 0.0.40
codegen_flags: <defaults>
</compile_context>

<pallas_src>
import functools

import jax
import jax.numpy as jnp
from jax.experimental import pallas as pl
from jax.experimental.pallas import tpu as pltpu


def _round_up(n, m):
    return ((n + m - 1) // m) * m


def _mlp_kernel(*refs, dropout_p, use_dropout):
    if use_dropout:
        x_ref, w1_ref, b1_ref, w2_ref, b2_ref, bits_ref, o_ref = refs
    else:
        x_ref, w1_ref, b1_ref, w2_ref, b2_ref, o_ref = refs
        bits_ref = None

    # ---- Linear 1 (MXU, f32 accumulate) + bias + ReLU ----
    h = jnp.dot(x_ref[...], w1_ref[...], preferred_element_type=jnp.float32)
    h = h + b1_ref[...]                      # (tb, H) + (1, H) broadcast
    h = jnp.maximum(h, 0.0)

    # ---- Inverted dropout: keep iff raw uint32 bits >= round(p * 2^32) ----
    if use_dropout:
        threshold = jnp.uint32(
            min(int(round(dropout_p * (1 << 32))), (1 << 32) - 1))
        keep = bits_ref[...] >= threshold
        h = jnp.where(keep, h * (1.0 / (1.0 - dropout_p)), 0.0)

    # ---- Linear 2 ----
    h = h.astype(w2_ref.dtype)               # bf16 feed for second MXU matmul
    out = jnp.dot(h, w2_ref[...], preferred_element_type=jnp.float32)
    out = out + b2_ref[...]
    o_ref[...] = out.astype(o_ref.dtype)


def mlp_forward(x, w1, b1, w2, b2, *, dropout_p=0.3, training=False,
                dropout_bits=None, rng_key=None, block_b=128,
                compute_dtype=jnp.bfloat16):
    """x: (B, Din); w1: (Din, H); b1: (H,); w2: (H, Dout); b2: (Dout,).

    Weights are stored pre-transposed ((in, out)) so the kernel computes
    y = x @ W + b directly on the MXU.  Dropout mask does not reproduce
    PyTorch's RNG (expected for a port), but the statistics match.
    """
    B, Din = x.shape
    H = w1.shape[1]
    Dout = w2.shape[1]
    out_dtype = x.dtype
    use_dropout = bool(training) and dropout_p > 0.0

    # Hardware-friendly padding: batch -> block_b, feature dims -> 128.
    block_b = max(8, _round_up(block_b, 8))
    B_p = _round_up(B, block_b)
    Din_p = _round_up(Din, 128)
    H_p = _round_up(H, 128)
    Dout_p = _round_up(Dout, 128)

    x_p = jnp.pad(x, ((0, B_p - B), (0, Din_p - Din))).astype(compute_dtype)
    w1_p = jnp.pad(w1, ((0, Din_p - Din), (0, H_p - H))).astype(compute_dtype)
    w2_p = jnp.pad(w2, ((0, H_p - H), (0, Dout_p - Dout))).astype(compute_dtype)
    b1_p = jnp.pad(b1, (0, H_p - H)).reshape(1, H_p).astype(jnp.float32)
    b2_p = jnp.pad(b2, (0, Dout_p - Dout)).reshape(1, Dout_p).astype(jnp.float32)

    inputs = [x_p, w1_p, b1_p, w2_p, b2_p]
    in_specs = [
        pl.BlockSpec((block_b, Din_p), lambda i: (i, 0)),   # x tile
        pl.BlockSpec((Din_p, H_p),     lambda i: (0, 0)),   # w1 (resident)
        pl.BlockSpec((1, H_p),         lambda i: (0, 0)),   # b1
        pl.BlockSpec((H_p, Dout_p),    lambda i: (0, 0)),   # w2 (resident)
        pl.BlockSpec((1, Dout_p),      lambda i: (0, 0)),   # b2
    ]

    if use_dropout:
        if dropout_bits is None:
            if rng_key is None:
                raise ValueError("training dropout needs dropout_bits or rng_key")
            dropout_bits = jax.random.bits(rng_key, (B, H), dtype=jnp.uint32)
        bits_p = jnp.pad(dropout_bits.astype(jnp.uint32),
                         ((0, B_p - B), (0, H_p - H)))
        inputs.append(bits_p)
        in_specs.append(pl.BlockSpec((block_b, H_p), lambda i: (i, 0)))

    out_spec = pl.BlockSpec((block_b, Dout_p), lambda i: (i, 0))
    grid = (B_p // block_b,)

    # Advisory cost estimate for XLA's scheduler.
    flops = 2 * B_p * (Din_p * H_p + H_p * Dout_p)
    bytes_accessed = sum(int(a.size) * a.dtype.itemsize for a in inputs)
    bytes_accessed += B_p * Dout_p * jnp.dtype(out_dtype).itemsize
    cost = pl.CostEstimate(flops=flops, transcendentals=0,
                           bytes_accessed=int(bytes_accessed))

    # Explicit VMEM budget: resident weights + double-buffered batch tiles.
    # TODO(synk): if the weight working set grows past ~24 MiB (v7x has only
    # 64 MiB physical VMEM), add an H/Din reduction grid axis with an f32
    # accumulator scratch instead of keeping both weight matrices resident.
    itemsize = jnp.dtype(compute_dtype).itemsize
    weight_bytes = (Din_p * H_p + H_p * Dout_p) * itemsize + (H_p + Dout_p) * 4
    tile_bytes = block_b * (Din_p * itemsize + Dout_p * 4 + H_p * 4
                            + (H_p * 4 if use_dropout else 0))
    vmem_limit = min(64 * 1024 * 1024,
                     max(32 * 1024 * 1024,
                         2 * (weight_bytes + tile_bytes) + (4 << 20)))

    kernel = functools.partial(_mlp_kernel, dropout_p=float(dropout_p),
                               use_dropout=use_dropout)

    out_p = pl.pallas_call(
        kernel,
        out_shape=jax.ShapeDtypeStruct((B_p, Dout_p), out_dtype),
        grid=grid,
        in_specs=in_specs,
        out_specs=out_spec,
        compiler_params=pltpu.CompilerParams(
            dimension_semantics=("parallel",),
            vmem_limit_bytes=int(vmem_limit)),
        cost_estimate=cost,
    )(*inputs)

    return out_p[:B, :Dout]


def mlp_reference(x, w1, b1, w2, b2, *, dropout_p=0.3, keep_mask=None):
    h = jnp.maximum(x @ w1 + b1, 0.0)
    if keep_mask is not None:
        h = jnp.where(keep_mask, h / (1.0 - dropout_p), 0.0)
    return h @ w2 + b2


if __name__ == "__main__":
    # Small shapes consistent with the module: Linear(Din, H) -> Linear(H, Dout).
    B, Din, H, Dout = 16, 32, 64, 16

    key = jax.random.PRNGKey(0)
    kx, kw1, kb1, kw2, kb2, kdrop = jax.random.split(key, 6)

    x = jax.random.normal(kx, (B, Din), dtype=jnp.float32)
    w1 = jax.random.normal(kw1, (Din, H), dtype=jnp.float32) / jnp.sqrt(Din)
    b1 = jax.random.normal(kb1, (H,), dtype=jnp.float32) * 0.01
    w2 = jax.random.normal(kw2, (H, Dout), dtype=jnp.float32) / jnp.sqrt(H)
    b2 = jax.random.normal(kb2, (Dout,), dtype=jnp.float32) * 0.01

    # 1) Eval path, f32 compute: tight check vs reference (Dropout is identity).
    out_f32 = jax.block_until_ready(
        mlp_forward(x, w1, b1, w2, b2, training=False,
                    compute_dtype=jnp.float32))
    ref = mlp_reference(x, w1, b1, w2, b2)
    assert out_f32.shape == (B, Dout)
    assert jnp.allclose(out_f32, ref, atol=1e-4, rtol=1e-4), "f32 eval mismatch"

    # 2) Eval path with bf16 MXU inputs (performance default): loose check.
    out_bf16 = jax.block_until_ready(
        mlp_forward(x, w1, b1, w2, b2, training=False))
    assert jnp.allclose(out_bf16, ref, atol=5e-2, rtol=5e-2), "bf16 eval mismatch"

    # 3) Training path: same random bits drive kernel and reference, so the
    #    dropout mask is checked exactly; also sanity-check the keep rate.
    p = 0.3
    bits = jax.random.bits(kdrop, (B, H), dtype=jnp.uint32)
    threshold = jnp.uint32(round(p * (1 << 32)))
    keep_mask = bits >= threshold
    out_train = jax.block_until_ready(
        mlp_forward(x, w1, b1, w2, b2, training=True, dropout_p=p,
                    dropout_bits=bits, compute_dtype=jnp.float32))
    ref_train = mlp_reference(x, w1, b1, w2, b2, dropout_p=p,
                              keep_mask=keep_mask)
    assert out_train.shape == (B, Dout)
    assert jnp.allclose(out_train, ref_train, atol=1e-4, rtol=1e-4), \
        "training (dropout) mismatch"
    keep_rate = float(jnp.mean(keep_mask.astype(jnp.float32)))
    assert abs(keep_rate - (1.0 - p)) < 0.08, f"bad keep rate {keep_rate}"

    print("KERNEL_OK")
</pallas_src>

<mosaic_0001>
module attributes {stable_mosaic.version = 11 : i64} {
  func.func @_mlp_kernel(%arg0: i32, %arg1: memref<128x128xf32, #tpu.memory_space<vmem>>, %arg2: memref<128x128xf32, #tpu.memory_space<vmem>>, %arg3: memref<1x128xf32, #tpu.memory_space<vmem>>, %arg4: memref<128x128xf32, #tpu.memory_space<vmem>>, %arg5: memref<1x128xf32, #tpu.memory_space<vmem>>, %arg6: memref<128x128xf32, #tpu.memory_space<vmem>>) attributes {dimension_semantics = [#tpu.dimension_semantics<parallel>], iteration_bounds = array<i64: 1>, scalar_prefetch = 0 : i64, scratch_operands = 0 : i64, tpu.core_type = #tpu.core_type<tc>, window_params = [{transform_indices = @transform_0, window_bounds = array<i64: 128, 128>}, {pipeline_mode = #tpu.pipeline_mode<synchronous>, transform_indices = @transform_1, window_bounds = array<i64: 128, 128>}, {pipeline_mode = #tpu.pipeline_mode<synchronous>, transform_indices = @transform_2, window_bounds = array<i64: 1, 128>}, {pipeline_mode = #tpu.pipeline_mode<synchronous>, transform_indices = @transform_3, window_bounds = array<i64: 128, 128>}, {pipeline_mode = #tpu.pipeline_mode<synchronous>, transform_indices = @transform_4, window_bounds = array<i64: 1, 128>}, {transform_indices = @transform_5, window_bounds = array<i64: 128, 128>}]} {
    %c0 = arith.constant 0 : index
    %c0_0 = arith.constant 0 : index
    %0 = vector.load %arg1[%c0, %c0_0] : memref<128x128xf32, #tpu.memory_space<vmem>>, vector<128x128xf32>
    %c0_1 = arith.constant 0 : index
    %c0_2 = arith.constant 0 : index
    %1 = vector.load %arg2[%c0_1, %c0_2] : memref<128x128xf32, #tpu.memory_space<vmem>>, vector<128x128xf32>
    %cst = arith.constant dense<0.000000e+00> : vector<128x128xf32>
    %2 = tpu.matmul %0, %1, %cst {dimension_numbers = #tpu.dot_dimension_numbers<[1], [0], [0], [1], [0, 0, 1, 1], [], []>} : vector<128x128xf32>, vector<128x128xf32>, vector<128x128xf32> -> vector<128x128xf32>
    %c0_3 = arith.constant 0 : index
    %c0_4 = arith.constant 0 : index
    %3 = vector.load %arg3[%c0_3, %c0_4] : memref<1x128xf32, #tpu.memory_space<vmem>>, vector<1x128xf32>
    %4 = vector.broadcast %3 : vector<1x128xf32> to vector<128x128xf32>
    %5 = arith.addf %2, %4 : vector<128x128xf32>
    %cst_5 = arith.constant 0.000000e+00 : f32
    %6 = vector.broadcast %cst_5 : f32 to vector<128x128xf32>
    %7 = arith.maximumf %5, %6 : vector<128x128xf32>
    %c0_6 = arith.constant 0 : index
    %c0_7 = arith.constant 0 : index
    %8 = vector.load %arg4[%c0_6, %c0_7] : memref<128x128xf32, #tpu.memory_space<vmem>>, vector<128x128xf32>
    %cst_8 = arith.constant dense<0.000000e+00> : vector<128x128xf32>
    %9 = tpu.matmul %7, %8, %cst_8 {dimension_numbers = #tpu.dot_dimension_numbers<[1], [0], [0], [1], [0, 0, 1, 1], [], []>} : vector<128x128xf32>, vector<128x128xf32>, vector<128x128xf32> -> vector<128x128xf32>
    %c0_9 = arith.constant 0 : index
    %c0_10 = arith.constant 0 : index
    %10 = vector.load %arg5[%c0_9, %c0_10] : memref<1x128xf32, #tpu.memory_space<vmem>>, vector<1x128xf32>
    %11 = vector.broadcast %10 : vector<1x128xf32> to vector<128x128xf32>
    %12 = arith.addf %9, %11 : vector<128x128xf32>
    %c0_11 = arith.constant 0 : index
    %c0_12 = arith.constant 0 : index
    %13 = vector.load %arg6[%c0_11, %c0_12] : memref<128x128xf32, #tpu.memory_space<vmem>>, vector<128x128xf32>
    tpu.vector_store %arg6[%c0_11, %c0_12], %12 {strides = array<i32>} : memref<128x128xf32, #tpu.memory_space<vmem>>, vector<128x128xf32>,
    return
  }
  func.func @transform_0(%arg0: i32) -> (i32, i32) {
    %c0_i32 = arith.constant 0 : i32
    %c0_i32_0 = arith.constant 0 : i32
    return %arg0, %c0_i32 : i32, i32
  }
  func.func @transform_1(%arg0: i32) -> (i32, i32) {
    %c0_i32 = arith.constant 0 : i32
    %c0_i32_0 = arith.constant 0 : i32
    %c0_i32_1 = arith.constant 0 : i32
    return %c0_i32, %c0_i32_0 : i32, i32
  }
  func.func @transform_2(%arg0: i32) -> (i32, i32) {
    %c0_i32 = arith.constant 0 : i32
    %c0_i32_0 = arith.constant 0 : i32
    %c0_i32_1 = arith.constant 0 : i32
    return %c0_i32, %c0_i32_0 : i32, i32
  }
  func.func @transform_3(%arg0: i32) -> (i32, i32) {
    %c0_i32 = arith.constant 0 : i32
    %c0_i32_0 = arith.constant 0 : i32
    %c0_i32_1 = arith.constant 0 : i32
    return %c0_i32, %c0_i32_0 : i32, i32
  }
  func.func @transform_4(%arg0: i32) -> (i32, i32) {
    %c0_i32 = arith.constant 0 : i32
    %c0_i32_0 = arith.constant 0 : i32
    %c0_i32_1 = arith.constant 0 : i32
    return %c0_i32, %c0_i32_0 : i32, i32
  }
  func.func @transform_5(%arg0: i32) -> (i32, i32) {
    %c0_i32 = arith.constant 0 : i32
    %c0_i32_0 = arith.constant 0 : i32
    return %arg0, %c0_i32 : i32, i32
  }
}

</mosaic_0001>

<bundles_post_ra>
// kernel: tpu_custom_call.1
= control target key start
LH: loop header
LB: loop body
LE: loop exit
PB: predicated region body
PF: predicated region fallthrough
CT: control target
= control target key end

     0   :  { %10 = vsyncpa [#allocation3], 0  ;;  %s915_s0 = inlined_call_operand.hbm [shape: f32[128,128], index: 0, kind: input, shape index: {}]   ;;  %s916_s1 = inlined_call_operand.hbm [shape: f32[128,128], index: 1, kind: input, shape index: {}]   ;;  %s917_s2 = inlined_call_operand.vmem [shape: f32[1,128], index: 2, kind: input, shape index: {}]   ;;  %s918_s3 = inlined_call_operand.hbm [shape: f32[128,128], index: 3, kind: input, shape index: {}]   ;;  %s919_s4 = inlined_call_operand.vmem [shape: f32[1,128], index: 4, kind: input, shape index: {}]   ;;  %s920_s5 = inlined_call_operand.hbm [shape: f32[128,128], index: 5, kind: output, shape index: {}]  }
   0x1   :  { %11 = vsyncpa [#allocation6], 0 }
   0x2   :  { %12 = vsyncpa [#allocation4], 0  ;;  %s806_s18 = smov [#allocation5]   ;;  %s807_s20 = smov [#allocation2]  }
   0x3   :  { %s30_s19 = sshll.u32 %s806_s18, 4  ;;  %s18_s21 = sshll.u32 %s807_s20, 4  ;;  %s31_s19 = int_to_ptr.vmem [resolvable:$true] %s30_s19  ;;  %s842_s21 = int_to_ptr.vmem [resolvable:$true] %s18_s21 }
   0x4   :  { %s712_s24 = scalar_lea.hbm %s916_s1, 2048 }
   0x5   :  { %p713_p0 = scmp.ne.s32.totalorder %s916_s1, %s712_s24  ;;  %p716_p1 = scmp.lt.u32.totalorder %s712_s24, %s916_s1 }
   0x7   :  { %p718_p2 = pnand %p716_p1, %p713_p0 }
   0x9   :  { %721 = shalt.err (!%p718_p2)
}
   0xa   :  { %s722_s29 = scalar_lea.vmem %s31_s19, 2048  ;;  %p727_p4 = scmp.lt.s32.totalorder %s31_s19, %s31_s19 }
   0xb   :  { %p723_p3 = scmp.ne.s32.totalorder %s31_s19, %s722_s29  ;;  %p728_p5 = scmp.lt.s32.totalorder %s722_s29, %s722_s29 }
   0xd   :  { %p729_p6 = por %p728_p5, %p727_p4 }
   0xf   :  { %p730_p7 = pnand %p729_p6, %p723_p3 }
  0x11   :  { %733 = shalt.err (!%p730_p7)
}
  0x12   :  { %s808_s30 = smov 128   ;;  %s809_s6 = smov 8  }
  0x13   :  { %36 = dma.hbm_to_vmem [thread:$0]  %s916_s1, 2048, %s31_s19, [#allocation6], %s808_s30, %s808_s30, %s809_s6  }
  0x14   :  { %s734_s11 = scalar_lea.hbm %s915_s0, 2048 }
  0x15   :  { %p735_p8 = scmp.ne.s32.totalorder %s915_s0, %s734_s11  ;;  %p738_p9 = scmp.lt.u32.totalorder %s734_s11, %s915_s0 }
  0x17   :  { %p740_p10 = pnand %p738_p9, %p735_p8 }
  0x19   :  { %743 = shalt.err (!%p740_p10)
}
  0x1a   :  { %s744_s16 = scalar_lea.vmem %s842_s21, 2048  ;;  %p749_p12 = scmp.lt.s32.totalorder %s842_s21, %s842_s21 }
  0x1b   :  { %p745_p11 = scmp.ne.s32.totalorder %s842_s21, %s744_s16  ;;  %p750_p13 = scmp.lt.s32.totalorder %s744_s16, %s744_s16 }
  0x1d   :  { %p751_p0 = por %p750_p13, %p749_p12 }
  0x1f   :  { %p752_p1 = pnand %p751_p0, %p745_p11 }
  0x21   :  { %755 = shalt.err (!%p752_p1)
}
  0x22   :  { %24 = dma.hbm_to_vmem [thread:$0]  %s915_s0, 2048, %s842_s21, [#allocation3], %s808_s30, %s808_s30, %s809_s6  }
  0x23   :  { %s810_s18 = smov [#allocation7]   ;;  %s756_s23 = scalar_lea.hbm %s918_s3, 2048 }
  0x24   :  { %s44_s19 = sshll.u32 %s810_s18, 4  ;;  %p757_p2 = scmp.ne.s32.totalorder %s918_s3, %s756_s23  ;;  %s45_s19 = int_to_ptr.vmem [resolvable:$true] %s44_s19 }
  0x25   :  { %p760_p3 = scmp.lt.u32.totalorder %s756_s23, %s918_s3 }
  0x27   :  { %p762_p4 = pnand %p760_p3, %p757_p2 }
  0x29   :  { %765 = shalt.err (!%p762_p4)
}
  0x2a   :  { %s766_s28 = scalar_lea.vmem %s45_s19, 2048  ;;  %p771_p6 = scmp.lt.s32.totalorder %s45_s19, %s45_s19 }
  0x2b   :  { %p767_p5 = scmp.ne.s32.totalorder %s45_s19, %s766_s28  ;;  %p772_p7 = scmp.lt.s32.totalorder %s766_s28, %s766_s28 }
  0x2d   :  { %p773_p8 = por %p772_p7, %p771_p6 }
  0x2f   :  { %p774_p9 = pnand %p773_p8, %p767_p5 }
  0x31   :  { %777 = shalt.err (!%p774_p9)
}
  0x32   :  { %50 = dma.hbm_to_vmem [thread:$0]  %s918_s3, 2048, %s45_s19, [#allocation6], %s808_s30, %s808_s30, %s809_s6  }
  0x33   :  { %800 = dma.done.wait [#allocation3], 2048  }
  0x34   :  { %801 = vsyncadd [#allocation3], 4294965248 }
  0x35   :  { %802 = dma.done.wait [#allocation6], 4096  }
  0x36   :  { %803 = vsyncadd [#allocation6], 4294963200  ;;  %v78_v0 = vld [vmem:[#allocation5] sm:$0xff]  ;;  %v79_v1 = vld [vmem:[#allocation5 + $0x8] sm:$0xff] }
  0x37   :  { %v80_v2 = vld [vmem:[#allocation5 + $0x10] sm:$0xff]  ;;  %v642_v3 = vpack.c.bf16 %v79_v1, %v78_v0  ;;  %v81_v4 = vld [vmem:[#allocation5 + $0x18] sm:$0xff]  ;;  %v82_v6 = vld [vmem:[#allocation5 + $0x20] sm:$0xff] }
  0x38   :  { %v646_v5 = vpack.c.bf16 %v81_v4, %v80_v2  ;;  %v83_v7 = vld [vmem:[#allocation5 + $0x28] sm:$0xff]  ;;  %v62_v9 = vld [vmem:[#allocation2] sm:$0xff]  ;;  %v84_v10 = vld [vmem:[#allocation5 + $0x30] sm:$0xff] }
  0x39   :  { %643 = vmatprep.subr.bf16.mxu0 %v642_v3  ;;  %v650_v8 = vpack.c.bf16 %v83_v7, %v82_v6  ;;  %v85_v11 = vld [vmem:[#allocation5 + $0x38] sm:$0xff]  ;;  %562 = vmatprep.mubr.f32.mxu0 %v62_v9  ;;  %v86_v13 = vld [vmem:[#allocation5 + $0x40] sm:$0xff]  ;;  %v87_v14 = vld [vmem:[#allocation5 + $0x48] sm:$0xff] }
  0x3a   :  { %645 = vmatpush3.bf16.msra.mxu0 %v642_v3  ;;  %v654_v12 = vpack.c.bf16 %v85_v11, %v84_v10  ;;  %v262_v15 = vld [vmem:[#allocation7] sm:$0xff]  ;;  %v263_v16 = vld [vmem:[#allocation7 + $0x8] sm:$0xff]  ;;  %v264_v17 = vld [vmem:[#allocation7 + $0x10] sm:$0xff]  ;;  %v658_v21 = vpack.c.bf16 %v87_v14, %v86_v13 }
  0x3b   :  { %647 = vmatprep.subr.bf16.mxu0 %v646_v5  ;;  %v265_v18 = vld [vmem:[#allocation7 + $0x18] sm:$0xff]  ;;  %v674_v19 = vpack.c.bf16 %v263_v16, %v262_v15  ;;  %v266_v22 = vld [vmem:[#allocation7 + $0x20] sm:$0xff]  ;;  %v267_v23 = vld [vmem:[#allocation7 + $0x28] sm:$0xff] }
  0x3c   :  { %v678_v20 = vpack.c.bf16 %v265_v18, %v264_v17  ;;  %v88_v24 = vld [vmem:[#allocation5 + $0x50] sm:$0xff]  ;;  %v89_v25 = vld [vmem:[#allocation5 + $0x58] sm:$0xff]  ;;  %v682_v26 = vpack.c.bf16 %v267_v23, %v266_v22  ;;  %v90_v30 = vld [vmem:[#allocation5 + $0x60] sm:$0xff] }
  0x3d   :  { %675 = vmatprep.subr.bf16.mxu1 %v674_v19  ;;  %v662_v27 = vpack.c.bf16 %v89_v25, %v88_v24  ;;  %v268_v28 = vld [vmem:[#allocation7 + $0x30] sm:$0xff]  ;;  %v269_v29 = vld [vmem:[#allocation7 + $0x38] sm:$0xff]  ;;  %v91_v31 = vld [vmem:[#allocation5 + $0x68] sm:$0xff] }
  0x3e   :  { %649 = vmatpush3.bf16.msra.mxu0 %v646_v5  ;;  %677 = vmatpush3.bf16.msra.mxu1 %v674_v19  ;;  %v686_v32 = vpack.c.bf16 %v269_v29, %v268_v28  ;;  %v666_v33 = vpack.c.bf16 %v91_v31, %v90_v30  ;;  %v270_v34 = vld [vmem:[#allocation7 + $0x40] sm:$0xff]  ;;  %v271_v35 = vld [vmem:[#allocation7 + $0x48] sm:$0xff]  ;;  %v92_v36 = vld [vmem:[#allocation5 + $0x70] sm:$0xff] }
  0x3f   :  { %651 = vmatprep.subr.bf16.mxu0 %v650_v8  ;;  %679 = vmatprep.subr.bf16.mxu1 %v678_v20  ;;  %v93_v37 = vld [vmem:[#allocation5 + $0x78] sm:$0xff]  ;;  %v690_v38 = vpack.c.bf16 %v271_v35, %v270_v34  ;;  %v272_v40 = vld [vmem:[#allocation7 + $0x50] sm:$0xff]  ;;  %v274_v43 = vld [vmem:[#allocation7 + $0x60] sm:$0xff] }
  0x40   :  { %v670_v39 = vpack.c.bf16 %v93_v37, %v92_v36  ;;  %v273_v41 = vld [vmem:[#allocation7 + $0x58] sm:$0xff]  ;;  %v275_v44 = vld [vmem:[#allocation7 + $0x68] sm:$0xff]  ;;  %v64_v47 = vld [vmem:[#allocation2 + $0x10] sm:$0xff] }
  0x41   :  { %v694_v42 = vpack.c.bf16 %v273_v41, %v272_v40  ;;  %v63_v45 = vld [vmem:[#allocation2 + $0x8] sm:$0xff]  ;;  %v698_v46 = vpack.c.bf16 %v275_v44, %v274_v43  ;;  %v65_v48 = vld [vmem:[#allocation2 + $0x18] sm:$0xff]  ;;  %v66_v49 = vld [vmem:[#allocation2 + $0x20] sm:$0xff] }
  0x42   :  { %653 = vmatpush3.bf16.msra.mxu0 %v650_v8  ;;  %681 = vmatpush3.bf16.msra.mxu1 %v678_v20  ;;  %v67_v50 = vld [vmem:[#allocation2 + $0x28] sm:$0xff]  ;;  %v68_v51 = vld [vmem:[#allocation2 + $0x30] sm:$0xff]  ;;  %v69_v52 = vld [vmem:[#allocation2 + $0x38] sm:$0xff] }
  0x43   :  { %655 = vmatprep.subr.bf16.mxu0 %v654_v12  ;;  %683 = vmatprep.subr.bf16.mxu1 %v682_v26  ;;  %v70_v53 = vld [vmem:[#allocation2 + $0x40] sm:$0xff]  ;;  %v71_v54 = vld [vmem:[#allocation2 + $0x48] sm:$0xff]  ;;  %v72_v55 = vld [vmem:[#allocation2 + $0x50] sm:$0xff] }
  0x44   :  { %v73_v56 = vld [vmem:[#allocation2 + $0x58] sm:$0xff]  ;;  %v74_v57 = vld [vmem:[#allocation2 + $0x60] sm:$0xff]  ;;  %v75_v58 = vld [vmem:[#allocation2 + $0x68] sm:$0xff] }
  0x45   :  { %v76_v59 = vld [vmem:[#allocation2 + $0x70] sm:$0xff]  ;;  %v77_v60 = vld [vmem:[#allocation2 + $0x78] sm:$0xff]  ;;  %v464_v0 = vld [vmem:[%s917_s2] ss:$0 sm:$0xff] }
  0x46   :  { %657 = vmatpush3.bf16.msra.mxu0 %v654_v12  ;;  %685 = vmatpush3.bf16.msra.mxu1 %v682_v26  ;;  %v276_v61 = vld [vmem:[#allocation7 + $0x70] sm:$0xff]  ;;  %v277_v62 = vld [vmem:[#allocation7 + $0x78] sm:$0xff] }
  0x47   :  { %659 = vmatprep.subr.bf16.mxu0 %v658_v21  ;;  %687 = vmatprep.subr.bf16.mxu1 %v686_v32  ;;  %v702_v63 = vpack.c.bf16 %v277_v62, %v276_v61 }
  0x4a   :  { %661 = vmatpush3.bf16.msra.mxu0 %v658_v21  ;;  %689 = vmatpush3.bf16.msra.mxu1 %v686_v32 }
  0x4b   :  { %663 = vmatprep.subr.bf16.mxu0 %v662_v27  ;;  %691 = vmatprep.subr.bf16.mxu1 %v690_v38 }
  0x4e   :  { %665 = vmatpush3.bf16.msra.mxu0 %v662_v27  ;;  %693 = vmatpush3.bf16.msra.mxu1 %v690_v38 }
  0x4f   :  { %667 = vmatprep.subr.bf16.mxu0 %v666_v33  ;;  %695 = vmatprep.subr.bf16.mxu1 %v694_v42 }
  0x52   :  { %669 = vmatpush3.bf16.msra.mxu0 %v666_v33  ;;  %697 = vmatpush3.bf16.msra.mxu1 %v694_v42 }
  0x53   :  { %671 = vmatprep.subr.bf16.mxu0 %v670_v39  ;;  %699 = vmatprep.subr.bf16.mxu1 %v698_v46 }
  0x56   :  { %673 = vmatpush3.bf16.msra.mxu0 %v670_v39  ;;  %701 = vmatpush3.bf16.msra.mxu1 %v698_v46 }
  0x57   :  { %703 = vmatprep.subr.bf16.mxu1 %v702_v63 }
  0x59   :  { %563 = vmatmul.mubr.f32.vlgmr.msra.gmra.mrb[0].mxu0 %v63_v45 }
  0x5a   :  { %565 = vmatprep.mubr.f32.mxu0 %v64_v47  ;;  %705 = vmatpush3.bf16.msra.mxu1 %v702_v63 }
  0x5d   :  { %566 = vmatmul.mubr.f32.gmra.mrb[2].mxu0 %v65_v48 }
  0x5e   :  { %568 = vmatprep.mubr.f32.mxu0 %v66_v49  ;;  %v465_v49 = vld [vmem:[%s919_s4] ss:$0 sm:$0xff]  ;;  %s811_s4 = smov [#allocation8]  }
  0x5f   :  { %s451_s8 = sshll.u32 %s811_s4, 4  ;;  %s452_s8 = int_to_ptr.vmem [resolvable:$true] %s451_s8 }
  0x60   :  { %s778_s9 = scalar_lea.vmem %s452_s8, 2048  ;;  %p783_p11 = scmp.lt.s32.totalorder %s452_s8, %s452_s8 }
  0x61   :  { %569 = vmatmul.mubr.f32.gmra.mrb[4].mxu0 %v67_v50  ;;  %p779_p10 = scmp.ne.s32.totalorder %s452_s8, %s778_s9  ;;  %p784_p12 = scmp.lt.s32.totalorder %s778_s9, %s778_s9 }
  0x62   :  { %571 = vmatprep.mubr.f32.mxu0 %v68_v51 }
  0x63   :  { %p785_p13 = por %p784_p12, %p783_p11 }
  0x65   :  { %572 = vmatmul.mubr.f32.gmra.mrb[6].mxu0 %v69_v52  ;;  %p786_p0 = pnand %p785_p13, %p779_p10 }
  0x66   :  { %574 = vmatprep.mubr.f32.mxu0 %v70_v53 }
  0x69   :  { %575 = vmatmul.mubr.f32.gmra.mrb[8].mxu0 %v71_v54 }
  0x6a   :  { %577 = vmatprep.mubr.f32.mxu0 %v72_v55 }
  0x6d   :  { %578 = vmatmul.mubr.f32.gmra.mrb[10].mxu0 %v73_v56 }
  0x6e   :  { %580 = vmatprep.mubr.f32.mxu0 %v74_v57 }
  0x71   :  { %581 = vmatmul.mubr.f32.gmra.mrb[12].mxu0 %v75_v58 }
  0x72   :  { %583 = vmatprep.mubr.f32.mxu0 %v76_v59 }
  0x75   :  { %584 = vmatmul.mubr.f32.gmra.mrb[14].mxu0 %v77_v60 }
 0x12c   :  { %v564_v1 = vpop.f32.mrb[0].mxu0 }
 0x12d   :  { %v173_v2 = vadd.f32 %v564_v1, %v464_v0  ;;  %v167_v3 = vpop.f32.mrb[1].mxu0 }
 0x12e   :  { %v168_v4 = vadd.f32 %v464_v0, %v167_v3 }
 0x12f   :  { %v247_v7 = vmax.f32 %v173_v2, 0.0 }
 0x130   :  { %v567_v5 = vpop.f32.mrb[2].mxu0  ;;  %v246_v6 = vmax.f32 %v168_v4, 0.0 }
 0x131   :  { %v183_v8 = vadd.f32 %v567_v5, %v464_v0  ;;  %v177_v9 = vpop.f32.mrb[3].mxu0 }
 0x132   :  { %v178_v10 = vadd.f32 %v464_v0, %v177_v9  ;;  %618 = vmatprep.mubr.f32.mxu1 %v246_v6 }
 0x133   :  { %619 = vmatmul.mubr.f32.vlgmr.msra.gmra.mrb[0].mxu1 %v247_v7  ;;  %v249_v13 = vmax.f32 %v183_v8, 0.0 }
 0x134   :  { %v248_v11 = vmax.f32 %v178_v10, 0.0  ;;  %v570_v12 = vpop.f32.mrb[4].mxu0 }
 0x135   :  { %v193_v14 = vadd.f32 %v570_v12, %v464_v0  ;;  %v187_v15 = vpop.f32.mrb[5].mxu0 }
 0x136   :  { %v188_v16 = vadd.f32 %v464_v0, %v187_v15  ;;  %621 = vmatprep.mubr.f32.mxu1 %v248_v11 }
 0x137   :  { %622 = vmatmul.mubr.f32.gmra.mrb[2].mxu1 %v249_v13  ;;  %v251_v19 = vmax.f32 %v193_v14, 0.0 }
 0x138   :  { %v250_v17 = vmax.f32 %v188_v16, 0.0  ;;  %v573_v18 = vpop.f32.mrb[6].mxu0 }
 0x139   :  { %v203_v20 = vadd.f32 %v573_v18, %v464_v0  ;;  %v197_v21 = vpop.f32.mrb[7].mxu0 }
 0x13a   :  { %v198_v22 = vadd.f32 %v464_v0, %v197_v21  ;;  %624 = vmatprep.mubr.f32.mxu1 %v250_v17 }
 0x13b   :  { %625 = vmatmul.mubr.f32.gmra.mrb[4].mxu1 %v251_v19  ;;  %v253_v25 = vmax.f32 %v203_v20, 0.0 }
 0x13c   :  { %v252_v23 = vmax.f32 %v198_v22, 0.0  ;;  %v576_v24 = vpop.f32.mrb[8].mxu0 }
 0x13d   :  { %v213_v26 = vadd.f32 %v576_v24, %v464_v0  ;;  %v207_v27 = vpop.f32.mrb[9].mxu0 }
 0x13e   :  { %v208_v28 = vadd.f32 %v464_v0, %v207_v27  ;;  %627 = vmatprep.mubr.f32.mxu1 %v252_v23 }
 0x13f   :  { %628 = vmatmul.mubr.f32.gmra.mrb[6].mxu1 %v253_v25  ;;  %v255_v31 = vmax.f32 %v213_v26, 0.0 }
 0x140   :  { %v254_v29 = vmax.f32 %v208_v28, 0.0  ;;  %v579_v30 = vpop.f32.mrb[10].mxu0 }
 0x141   :  { %v223_v32 = vadd.f32 %v579_v30, %v464_v0  ;;  %v217_v33 = vpop.f32.mrb[11].mxu0 }
 0x142   :  { %v218_v34 = vadd.f32 %v464_v0, %v217_v33  ;;  %630 = vmatprep.mubr.f32.mxu1 %v254_v29 }
 0x143   :  { %631 = vmatmul.mubr.f32.gmra.mrb[8].mxu1 %v255_v31  ;;  %v257_v37 = vmax.f32 %v223_v32, 0.0 }
 0x144   :  { %v256_v35 = vmax.f32 %v218_v34, 0.0  ;;  %v582_v36 = vpop.f32.mrb[12].mxu0 }
 0x145   :  { %v233_v38 = vadd.f32 %v582_v36, %v464_v0  ;;  %v227_v39 = vpop.f32.mrb[13].mxu0 }
 0x146   :  { %v228_v40 = vadd.f32 %v464_v0, %v227_v39  ;;  %633 = vmatprep.mubr.f32.mxu1 %v256_v35 }
 0x147   :  { %634 = vmatmul.mubr.f32.gmra.mrb[10].mxu1 %v257_v37  ;;  %v259_v43 = vmax.f32 %v233_v38, 0.0 }
 0x148   :  { %v258_v41 = vmax.f32 %v228_v40, 0.0  ;;  %v585_v42 = vpop.f32.mrb[14].mxu0 }
 0x149   :  { %v243_v44 = vadd.f32 %v585_v42, %v464_v0  ;;  %v237_v45 = vpop.f32.mrb[15].mxu0 }
 0x14a   :  { %v238_v46 = vadd.f32 %v464_v0, %v237_v45  ;;  %636 = vmatprep.mubr.f32.mxu1 %v258_v41 }
 0x14b   :  { %637 = vmatmul.mubr.f32.gmra.mrb[12].mxu1 %v259_v43  ;;  %v261_v48 = vmax.f32 %v243_v44, 0.0 }
 0x14c   :  { %v260_v47 = vmax.f32 %v238_v46, 0.0 }
 0x14e   :  { %639 = vmatprep.mubr.f32.mxu1 %v260_v47 }
 0x14f   :  { %640 = vmatmul.mubr.f32.gmra.mrb[14].mxu1 %v261_v48 }
 0x206   :  { %v620_v50 = vpop.f32.mrb[0].mxu1 }
 0x207   :  { %v357_v51 = vadd.f32 %v620_v50, %v465_v49  ;;  %v351_v52 = vpop.f32.mrb[1].mxu1 }
 0x208   :  { %v352_v53 = vadd.f32 %v465_v49, %v351_v52 }
 0x209   :  { %431 = vst [vmem:[#allocation8 + $0x8] sm:$0xff] %v357_v51 }
 0x20a   :  { %430 = vst [vmem:[#allocation8] sm:$0xff] %v352_v53  ;;  %v623_v54 = vpop.f32.mrb[2].mxu1 }
 0x20b   :  { %v367_v55 = vadd.f32 %v623_v54, %v465_v49  ;;  %v361_v56 = vpop.f32.mrb[3].mxu1 }
 0x20c   :  { %v362_v57 = vadd.f32 %v465_v49, %v361_v56 }
 0x20d   :  { %433 = vst [vmem:[#allocation8 + $0x18] sm:$0xff] %v367_v55 }
 0x20e   :  { %432 = vst [vmem:[#allocation8 + $0x10] sm:$0xff] %v362_v57  ;;  %v626_v58 = vpop.f32.mrb[4].mxu1 }
 0x20f   :  { %v377_v59 = vadd.f32 %v626_v58, %v465_v49  ;;  %v371_v60 = vpop.f32.mrb[5].mxu1 }
 0x210   :  { %v372_v61 = vadd.f32 %v465_v49, %v371_v60 }
 0x211   :  { %435 = vst [vmem:[#allocation8 + $0x28] sm:$0xff] %v377_v59 }
 0x212   :  { %434 = vst [vmem:[#allocation8 + $0x20] sm:$0xff] %v372_v61  ;;  %v629_v62 = vpop.f32.mrb[6].mxu1 }
 0x213   :  { %v387_v63 = vadd.f32 %v629_v62, %v465_v49  ;;  %v381_v0 = vpop.f32.mrb[7].mxu1 }
 0x214   :  { %v382_v1 = vadd.f32 %v465_v49, %v381_v0 }
 0x215   :  { %437 = vst [vmem:[#allocation8 + $0x38] sm:$0xff] %v387_v63 }
 0x216   :  { %436 = vst [vmem:[#allocation8 + $0x30] sm:$0xff] %v382_v1  ;;  %v632_v2 = vpop.f32.mrb[8].mxu1 }
 0x217   :  { %v397_v3 = vadd.f32 %v632_v2, %v465_v49  ;;  %v391_v4 = vpop.f32.mrb[9].mxu1 }
 0x218   :  { %v392_v5 = vadd.f32 %v465_v49, %v391_v4 }
 0x219   :  { %439 = vst [vmem:[#allocation8 + $0x48] sm:$0xff] %v397_v3 }
 0x21a   :  { %438 = vst [vmem:[#allocation8 + $0x40] sm:$0xff] %v392_v5  ;;  %v635_v6 = vpop.f32.mrb[10].mxu1 }
 0x21b   :  { %v407_v7 = vadd.f32 %v635_v6, %v465_v49  ;;  %v401_v8 = vpop.f32.mrb[11].mxu1 }
 0x21c   :  { %v402_v9 = vadd.f32 %v465_v49, %v401_v8 }
 0x21d   :  { %441 = vst [vmem:[#allocation8 + $0x58] sm:$0xff] %v407_v7 }
 0x21e   :  { %440 = vst [vmem:[#allocation8 + $0x50] sm:$0xff] %v402_v9  ;;  %v638_v10 = vpop.f32.mrb[12].mxu1 }
 0x21f   :  { %v417_v11 = vadd.f32 %v638_v10, %v465_v49  ;;  %v411_v12 = vpop.f32.mrb[13].mxu1 }
 0x220   :  { %v412_v13 = vadd.f32 %v465_v49, %v411_v12 }
 0x221   :  { %443 = vst [vmem:[#allocation8 + $0x68] sm:$0xff] %v417_v11 }
 0x222   :  { %442 = vst [vmem:[#allocation8 + $0x60] sm:$0xff] %v412_v13  ;;  %v641_v14 = vpop.f32.mrb[14].mxu1 }
 0x223   :  { %v427_v15 = vadd.f32 %v641_v14, %v465_v49  ;;  %v421_v16 = vpop.f32.mrb[15].mxu1 }
 0x224   :  { %v422_v17 = vadd.f32 %v465_v49, %v421_v16 }
 0x225   :  { %445 = vst [vmem:[#allocation8 + $0x78] sm:$0xff] %v427_v15 }
 0x226   :  { %444 = vst [vmem:[#allocation8 + $0x70] sm:$0xff] %v422_v17 }
 0x227   :  { %789 = shalt.err (!%p786_p0)
}
 0x228   :  { %s790_s12 = scalar_lea.hbm %s920_s5, 2048 }
 0x229   :  { %p791_p1 = scmp.ne.s32.totalorder %s920_s5, %s790_s12  ;;  %p794_p2 = scmp.lt.u32.totalorder %s790_s12, %s920_s5 }
 0x22b   :  { %p796_p3 = pnand %p794_p2, %p791_p1 }
 0x22d   :  { %799 = shalt.err (!%p796_p3)
}
 0x22e   :  { %457 = dma.vmem_to_hbm [thread:$0]  %s452_s8, 2048, %s920_s5, [#allocation4], %s808_s30, %s808_s30, %s809_s6  }
 0x22f   :  { %804 = dma.done.wait [#allocation4], 2048  }
 0x230   :  { %805 = vsyncadd [#allocation4], 4294965248 }
 0x231   :  { %461 = vsyncpa [#allocation3], 1 }
 0x232   :  { %462 = vsyncpa [#allocation6], 1 }
 0x233   :  { %463 = vsyncpa [#allocation4], 1 }

</bundles_post_ra>
